<compile_context>
chip_gen: v6e
topology: v6e:2x2x1
jax: 0.10.0
libtpu: 0.0.40
codegen_flags: <defaults>
</compile_context>

<pallas_src>
import jax
import jax.numpy as jnp
from jax.experimental import pallas as pl
from jax.experimental.pallas import tpu as pltpu

_LANES = 128


def _mish_kernel(x_ref, o_ref):
    x = x_ref[...]
    xf = x.astype(jnp.float32)
    # Mish(x) = x * tanh(softplus(x)) = x * (t^2 + 2t) / (t^2 + 2t + 2), t = exp(x).
    # One EUP exp + one EUP approx reciprocal; everything else is VPU work.
    t = jnp.exp(jnp.minimum(xf, 20.0))   # clamp: exp(20)^2 ~ 2.4e17 << f32 max
    u = t * (t + 2.0)
    d = u + 2.0
    r = pl.reciprocal(d, approx=True)
    # Two Newton-Raphson refinements (cheap VPU ops) -> ~full f32 precision.
    r = r * (2.0 - d * r)
    r = r * (2.0 - d * r)
    o_ref[...] = (xf * u * r).astype(o_ref.dtype)


def mish_pallas(x: jax.Array, *, tile_rows: int = 2048) -> jax.Array:
    """Elementwise Mish over an arbitrary-shaped array (matches x * tanh(softplus(x)))."""
    orig_shape = x.shape
    orig_dtype = x.dtype

    flat = x.reshape(-1)
    n = flat.shape[0]

    # Pad only to a 128-lane multiple, and only when needed (conv feature maps
    # with numel % 128 == 0 take the zero-copy path).
    pad = (-n) % _LANES
    if pad:
        flat = jnp.pad(flat, (0, pad))
    rows = flat.shape[0] // _LANES
    x2d = flat.reshape(rows, _LANES)

    # Block: (tr, 128), tr a multiple of 8.  Clamp to the array size for tiny
    # inputs; otherwise use the big default (1 MiB f32 block -> ~85% roofline).
    tr = min(tile_rows, ((rows + 7) // 8) * 8)
    grid = (pl.cdiv(rows, tr),)

    numel = rows * _LANES
    itemsize = jnp.dtype(orig_dtype).itemsize

    out2d = pl.pallas_call(
        _mish_kernel,
        out_shape=jax.ShapeDtypeStruct((rows, _LANES), orig_dtype),
        grid_spec=pltpu.PrefetchScalarGridSpec(
            num_scalar_prefetch=0,
            grid=grid,
            in_specs=[pl.BlockSpec((tr, _LANES), lambda i: (i, 0))],
            out_specs=pl.BlockSpec((tr, _LANES), lambda i: (i, 0)),
        ),
        compiler_params=pltpu.CompilerParams(
            dimension_semantics=("parallel",)),
        cost_estimate=pl.CostEstimate(
            flops=8 * numel,              # muls/adds/min + NR refinements
            transcendentals=2 * numel,    # exp + approx reciprocal
            bytes_accessed=2 * numel * itemsize),
    )(x2d)

    out_flat = out2d.reshape(-1)
    if pad:
        out_flat = out_flat[:n]
    return out_flat.reshape(orig_shape)


def mish_reference(x: jax.Array) -> jax.Array:
    xf = x.astype(jnp.float32)
    # Numerically-stable softplus: max(x, 0) + log1p(exp(-|x|))
    sp = jnp.maximum(xf, 0.0) + jnp.log1p(jnp.exp(-jnp.abs(xf)))
    return (xf * jnp.tanh(sp)).astype(x.dtype)


if __name__ == "__main__":
    key = jax.random.PRNGKey(0)
    # Shape consistent with an NCHW conv-feature-map input.
    x = jax.random.normal(key, (2, 4, 16, 16), dtype=jnp.float32) * 3.0

    out = mish_pallas(x)
    jax.block_until_ready(out)

    ref = mish_reference(x)
    assert out.shape == x.shape and out.dtype == x.dtype
    assert jnp.allclose(out, ref, atol=1e-5, rtol=1e-4)

    # Ragged shape: exercises the lane-pad path and the partial last block
    # (rows=14, tile_rows=8 -> grid of 2 with a masked partial block).
    x2 = jax.random.normal(jax.random.PRNGKey(1), (3, 5, 9, 13), dtype=jnp.float32) * 4.0
    out2 = mish_pallas(x2, tile_rows=8)
    jax.block_until_ready(out2)
    ref2 = mish_reference(x2)
    assert out2.shape == x2.shape and out2.dtype == x2.dtype
    assert jnp.allclose(out2, ref2, atol=1e-5, rtol=1e-4)

    print("KERNEL_OK")
</pallas_src>

<mosaic_0001>
module attributes {stable_mosaic.version = 11 : i64} {
  func.func @_mish_kernel(%arg0: i32, %arg1: memref<16x128xf32, #tpu.memory_space<vmem>>, %arg2: memref<16x128xf32, #tpu.memory_space<vmem>>) attributes {dimension_semantics = [#tpu.dimension_semantics<parallel>], iteration_bounds = array<i64: 1>, scalar_prefetch = 0 : i64, scratch_operands = 0 : i64, tpu.core_type = #tpu.core_type<tc>, window_params = [{transform_indices = @transform_0, window_bounds = array<i64: 16, 128>}, {transform_indices = @transform_1, window_bounds = array<i64: 16, 128>}]} {
    %c0 = arith.constant 0 : index
    %c0_0 = arith.constant 0 : index
    %0 = vector.load %arg1[%c0, %c0_0] : memref<16x128xf32, #tpu.memory_space<vmem>>, vector<16x128xf32>
    %cst = arith.constant 2.000000e+01 : f32
    %1 = vector.broadcast %cst : f32 to vector<16x128xf32>
    %2 = arith.minimumf %0, %1 : vector<16x128xf32>
    %3 = math.exp %2 : vector<16x128xf32>
    %cst_1 = arith.constant 2.000000e+00 : f32
    %4 = vector.broadcast %cst_1 : f32 to vector<16x128xf32>
    %5 = arith.addf %3, %4 : vector<16x128xf32>
    %6 = arith.mulf %3, %5 : vector<16x128xf32>
    %cst_2 = arith.constant 2.000000e+00 : f32
    %7 = vector.broadcast %cst_2 : f32 to vector<16x128xf32>
    %8 = arith.addf %6, %7 : vector<16x128xf32>
    %9 = tpu.reciprocal %8 {approx = true} : vector<16x128xf32> -> vector<16x128xf32>
    %10 = arith.mulf %8, %9 : vector<16x128xf32>
    %cst_3 = arith.constant 2.000000e+00 : f32
    %11 = vector.broadcast %cst_3 : f32 to vector<16x128xf32>
    %12 = arith.subf %11, %10 : vector<16x128xf32>
    %13 = arith.mulf %9, %12 : vector<16x128xf32>
    %14 = arith.mulf %8, %13 : vector<16x128xf32>
    %cst_4 = arith.constant 2.000000e+00 : f32
    %15 = vector.broadcast %cst_4 : f32 to vector<16x128xf32>
    %16 = arith.subf %15, %14 : vector<16x128xf32>
    %17 = arith.mulf %13, %16 : vector<16x128xf32>
    %18 = arith.mulf %0, %6 : vector<16x128xf32>
    %19 = arith.mulf %18, %17 : vector<16x128xf32>
    %c0_5 = arith.constant 0 : index
    %c0_6 = arith.constant 0 : index
    %20 = vector.load %arg2[%c0_5, %c0_6] : memref<16x128xf32, #tpu.memory_space<vmem>>, vector<16x128xf32>
    tpu.vector_store %arg2[%c0_5, %c0_6], %19 {strides = array<i32>} : memref<16x128xf32, #tpu.memory_space<vmem>>, vector<16x128xf32>,
    return
  }
  func.func @transform_0(%arg0: i32) -> (i32, i32) {
    %c0_i32 = arith.constant 0 : i32
    %c0_i32_0 = arith.constant 0 : i32
    return %arg0, %c0_i32 : i32, i32
  }
  func.func @transform_1(%arg0: i32) -> (i32, i32) {
    %c0_i32 = arith.constant 0 : i32
    %c0_i32_0 = arith.constant 0 : i32
    return %arg0, %c0_i32 : i32, i32
  }
}

</mosaic_0001>

<bundles_post_ra>
// kernel: tpu_custom_call.1
= control target key start
LH: loop header
LB: loop body
LE: loop exit
PB: predicated region body
PF: predicated region fallthrough
CT: control target
= control target key end

     0   :  { %6 = vsyncpa [#allocation3], 0  ;;  %s156_s0 = inlined_call_operand.hbm [shape: f32[16,128], index: 0, kind: input, shape index: {}]   ;;  %s157_s1 = inlined_call_operand.hbm [shape: f32[16,128], index: 1, kind: output, shape index: {}]  }
   0x1   :  { %7 = vsyncpa [#allocation4], 0  ;;  %s130_s6 = smov [#allocation2]  }
   0x2   :  { %s13_s7 = sshll.u32 %s130_s6, 4  ;;  %s14_s7 = int_to_ptr.vmem [resolvable:$true] %s13_s7 }
   0x3   :  { %s94_s8 = scalar_lea.vmem %s14_s7, 256  ;;  %p99_p1 = scmp.lt.s32.totalorder %s14_s7, %s14_s7 }
   0x4   :  { %p95_p0 = scmp.ne.s32.totalorder %s14_s7, %s94_s8  ;;  %p100_p2 = scmp.lt.s32.totalorder %s94_s8, %s94_s8 }
   0x6   :  { %p101_p3 = por %p100_p2, %p99_p1 }
   0x8   :  { %p102_p4 = pnand %p101_p3, %p95_p0 }
   0xa   :  { %105 = shalt.err (!%p102_p4)
}
   0xb   :  { %s131_s9 = smov 128   ;;  %s132_s10 = smov 8  }
   0xc   :  { %19 = dma.hbm_to_vmem [thread:$0]  %s156_s0, 256, %s14_s7, [#allocation3], %s131_s9, %s131_s9, %s132_s10  }
   0xd   :  { %126 = dma.done.wait [#allocation3], 256  }
   0xe   :  { %127 = vsyncadd [#allocation3], 4294967040  ;;  %v23_v0 = vld [vmem:[#allocation2] sm:$0xff]  ;;  %v24_v1 = vld [vmem:[#allocation2 + $0x8] sm:$0xff]  ;;  %s133_s0 = smov [#allocation5]  }
   0xf   :  { %v25_v2 = vmin.f32 %v23_v0, 20.0  ;;  %v26_v3 = vmin.f32 %v24_v1, 20.0  ;;  %s62_s13 = sshll.u32 %s133_s0, 4  ;;  %s63_s13 = int_to_ptr.vmem [resolvable:$true] %s62_s13 }
  0x10   :  { %s106_s14 = scalar_lea.vmem %s63_s13, 256  ;;  %p111_p6 = scmp.lt.s32.totalorder %s63_s13, %s63_s13 }
  0x11   :  { %v27_v4 = vmul.f32 1.442695, %v25_v2  ;;  %v29_v5 = vmul.f32 1.442695, %v26_v3  ;;  %p107_p5 = scmp.ne.s32.totalorder %s63_s13, %s106_s14  ;;  %p112_p7 = scmp.lt.s32.totalorder %s106_s14, %s106_s14 }
  0x13   :  { %78 = vpow2.f32 %v27_v4  ;;  %p113_p8 = por %p112_p7, %p111_p6 }
  0x14   :  { %80 = vpow2.f32 %v29_v5 }
  0x15   :  { %p114_p9 = pnand %p113_p8, %p107_p5 }
  0x20   :  { %v79_v6 = vpop.eup %78 }
  0x21   :  { %v81_v7 = vpop.eup %80  ;;  %v31_v8 = vadd.f32 2.0, %v79_v6 }
  0x22   :  { %v32_v9 = vadd.f32 2.0, %v81_v7 }
  0x23   :  { %v33_v10 = vmul.f32 %v79_v6, %v31_v8 }
  0x24   :  { %v34_v11 = vmul.f32 %v81_v7, %v32_v9 }
  0x25   :  { %v35_v12 = vadd.f32 2.0, %v33_v10  ;;  %v51_v25 = vmul.f32 %v33_v10, %v23_v0 }
  0x26   :  { %v36_v13 = vadd.f32 2.0, %v34_v11  ;;  %v52_v27 = vmul.f32 %v34_v11, %v24_v1 }
  0x27   :  { %82 = vrcp.f32 %v35_v12 }
  0x28   :  { %84 = vrcp.f32 %v36_v13 }
  0x34   :  { %v83_v14 = vpop.eup %82 }
  0x35   :  { %v85_v15 = vpop.eup %84  ;;  %v39_v16 = vmul.f32 %v83_v14, %v35_v12 }
  0x36   :  { %v40_v17 = vmul.f32 %v85_v15, %v36_v13 }
  0x37   :  { %v41_v18 = vsub.f32 2.0, %v39_v16 }
  0x38   :  { %v42_v19 = vsub.f32 2.0, %v40_v17 }
  0x39   :  { %v43_v20 = vmul.f32 %v83_v14, %v41_v18 }
  0x3a   :  { %v44_v21 = vmul.f32 %v85_v15, %v42_v19 }
  0x3b   :  { %v45_v22 = vmul.f32 %v43_v20, %v35_v12 }
  0x3c   :  { %v46_v23 = vmul.f32 %v44_v21, %v36_v13 }
  0x3d   :  { %v47_v24 = vsub.f32 2.0, %v45_v22 }
  0x3e   :  { %v48_v26 = vsub.f32 2.0, %v46_v23 }
  0x3f   :  { %v49_v28 = vmul.f32 %v47_v24, %v43_v20 }
  0x40   :  { %v50_v29 = vmul.f32 %v48_v26, %v44_v21 }
  0x41   :  { %v53_v30 = vmul.f32 %v51_v25, %v49_v28 }
  0x42   :  { %v54_v31 = vmul.f32 %v52_v27, %v50_v29 }
  0x43   :  { %55 = vst [vmem:[#allocation5] sm:$0xff] %v53_v30 }
  0x44   :  { %56 = vst [vmem:[#allocation5 + $0x8] sm:$0xff] %v54_v31 }
  0x45   :  { %117 = shalt.err (!%p114_p9)
}
  0x46   :  { %68 = dma.vmem_to_hbm [thread:$0]  %s63_s13, 256, %s157_s1, [#allocation4], %s131_s9, %s131_s9, %s132_s10  }
  0x47   :  { %128 = dma.done.wait [#allocation4], 256  }
  0x48   :  { %129 = vsyncadd [#allocation4], 4294967040 }
  0x49   :  { %72 = vsyncpa [#allocation3], 1 }
  0x4a   :  { %73 = vsyncpa [#allocation4], 1 }

</bundles_post_ra>
